<compile_context>
chip_gen: v5e
topology: v5e:2x2
jax: 0.10.0
libtpu: 0.0.40
codegen_flags: <defaults>
</compile_context>

<pallas_src>
import jax
import jax.numpy as jnp
from jax.experimental import pallas as pl
from jax.experimental.pallas import tpu as pltpu

HIDDEN_DIMS = 32
IN_FEATURES = 768        # = 3 * 16 * 16
OUT_FEATURES = 10
N_PAD = 128              # pad output features to one full lane width
DEFAULT_BLOCK_B = 2048   # batch rows per grid step (multiple of 16)
VMEM_LIMIT = 32 << 20    # explicit scoped-VMEM budget, safe on v5e/v6e/v7x


def _round_up(n, m):
    return ((n + m - 1) // m) * m


def fused_mlp_kernel(x_ref, w_ref, b_ref, o_ref):
    # x_ref: (TB, 768) f32   streamed per grid step (cast to bf16 in-register,
    #                        so x only crosses HBM once, as f32)
    # w_ref: (768, 128) bf16 resident (same block every step)
    # b_ref: (1, 128)  f32   resident
    # o_ref: (TB, 128) bf16  lane-dense store; sliced/cast back in the wrapper
    x_bf16 = x_ref[...].astype(jnp.bfloat16)
    acc = jnp.dot(x_bf16, w_ref[...], preferred_element_type=jnp.float32)
    o_ref[...] = (acc + b_ref[...]).astype(o_ref.dtype)


def mymodel_forward(x, w1, b1, w2, b2, *, block_b=DEFAULT_BLOCK_B):
    """x: (B, C, H, W) float32; returns (B, 10) float32."""
    B = x.shape[0]
    x_flat = x.reshape(B, -1)                  # Flatten (row-major, == PyTorch)
    assert x_flat.shape[1] == IN_FEATURES
    assert block_b % 16 == 0

    # --- one-time algebraic fusion of the two linears (tiny, plain JAX;
    #     constant-folded under jit when weights are static) ---
    w_fused = jnp.dot(w1, w2)                  # (768, 10) f32
    b_fused = jnp.dot(b1, w2) + b2             # (1, 10)   f32
    w_pad = jnp.pad(w_fused, ((0, 0), (0, N_PAD - OUT_FEATURES))
                    ).astype(jnp.bfloat16)     # (768, 128) bf16, resident
    b_pad = jnp.pad(b_fused, ((0, 0), (0, N_PAD - OUT_FEATURES)))  # (1,128) f32

    # Batch tile: multiple of 16 (bf16 output sublane packing; also ok for f32
    # input), capped by block_b.  No padding of x — the last grid step may be
    # a partial tile (OOB rows undefined on read, masked on write, and sliced
    # off below).
    tb = min(block_b, _round_up(B, 16))
    # v7x megacore: make sure large batches give >= 2 grid steps so the
    # "parallel" axis can be sharded across both TensorCores.
    if B >= 32 and pl.cdiv(B, tb) < 2:
        tb = _round_up(pl.cdiv(B, 2), 16)
    grid_b = pl.cdiv(B, tb)

    out_pad = pl.pallas_call(
        fused_mlp_kernel,
        out_shape=jax.ShapeDtypeStruct((B, N_PAD), jnp.bfloat16),
        grid=(grid_b,),
        in_specs=[
            pl.BlockSpec((tb, IN_FEATURES), lambda i: (i, 0)),      # streamed x
            pl.BlockSpec((IN_FEATURES, N_PAD), lambda i: (0, 0)),   # resident W
            pl.BlockSpec((1, N_PAD), lambda i: (0, 0)),             # resident b
        ],
        out_specs=pl.BlockSpec((tb, N_PAD), lambda i: (i, 0)),
        compiler_params=pltpu.CompilerParams(
            dimension_semantics=("parallel",),   # shard batch across TCs (v7x)
            vmem_limit_bytes=VMEM_LIMIT,
        ),
    )(x_flat, w_pad, b_pad)

    # Strip the output-feature lane padding and cast the tiny slice back to f32.
    return out_pad[:B, :OUT_FEATURES].astype(jnp.float32)


def init_params(key, hidden_dims=HIDDEN_DIMS):
    """Deterministic init mimicking nn.Linear's uniform(-1/sqrt(fan_in), ...)."""
    k1, k2, k3, k4 = jax.random.split(key, 4)
    bound1 = 1.0 / jnp.sqrt(IN_FEATURES)
    bound2 = 1.0 / jnp.sqrt(hidden_dims)
    # Stored pre-transposed: (in_features, out_features)
    w1 = jax.random.uniform(k1, (IN_FEATURES, hidden_dims),
                            minval=-bound1, maxval=bound1, dtype=jnp.float32)
    b1 = jax.random.uniform(k2, (1, hidden_dims),
                            minval=-bound1, maxval=bound1, dtype=jnp.float32)
    w2 = jax.random.uniform(k3, (hidden_dims, OUT_FEATURES),
                            minval=-bound2, maxval=bound2, dtype=jnp.float32)
    b2 = jax.random.uniform(k4, (1, OUT_FEATURES),
                            minval=-bound2, maxval=bound2, dtype=jnp.float32)
    return w1, b1, w2, b2


if __name__ == "__main__":
    key = jax.random.PRNGKey(0)
    k_x, k_p = jax.random.split(key)

    # x: (B=2, C=3, H=16, W=16) -> flatten -> 768 features
    x = jax.random.normal(k_x, (2, 3, 16, 16), dtype=jnp.float32)
    w1, b1, w2, b2 = init_params(k_p)

    fwd = jax.jit(mymodel_forward)
    out = jax.block_until_ready(fwd(x, w1, b1, w2, b2))

    # Pure-JAX f32 reference of the original two-layer module.
    x_flat = x.reshape(2, -1)
    ref = (x_flat @ w1 + b1) @ w2 + b2
    assert out.shape == (2, 10)
    # bf16 MXU path / bf16 output store -> loose-but-meaningful tolerance.
    assert jnp.allclose(out, ref, atol=5e-2, rtol=5e-2), (
        f"max abs err {jnp.max(jnp.abs(out - ref))}")

    print("KERNEL_OK")
</pallas_src>

<mosaic_0001>
module attributes {stable_mosaic.version = 11 : i64} {
  func.func @fused_mlp_kernel(%arg0: i32, %arg1: memref<16x768xf32, #tpu.memory_space<vmem>>, %arg2: memref<768x128xbf16, #tpu.memory_space<vmem>>, %arg3: memref<1x128xf32, #tpu.memory_space<vmem>>, %arg4: memref<16x128xbf16, #tpu.memory_space<vmem>>) attributes {dimension_semantics = [#tpu.dimension_semantics<parallel>], iteration_bounds = array<i64: 1>, scalar_prefetch = 0 : i64, scratch_operands = 0 : i64, tpu.core_type = #tpu.core_type<tc>, window_params = [{transform_indices = @transform_0, window_bounds = array<i64: 16, 768>}, {pipeline_mode = #tpu.pipeline_mode<synchronous>, transform_indices = @transform_1, window_bounds = array<i64: 768, 128>}, {pipeline_mode = #tpu.pipeline_mode<synchronous>, transform_indices = @transform_2, window_bounds = array<i64: 1, 128>}, {transform_indices = @transform_3, window_bounds = array<i64: 16, 128>}]} {
    %c0 = arith.constant 0 : index
    %c0_0 = arith.constant 0 : index
    %0 = vector.load %arg1[%c0, %c0_0] : memref<16x768xf32, #tpu.memory_space<vmem>>, vector<16x768xf32>
    %1 = arith.truncf %0 : vector<16x768xf32> to vector<16x768xbf16>
    %c0_1 = arith.constant 0 : index
    %c0_2 = arith.constant 0 : index
    %2 = vector.load %arg2[%c0_1, %c0_2] : memref<768x128xbf16, #tpu.memory_space<vmem>>, vector<768x128xbf16>
    %cst = arith.constant dense<0.000000e+00> : vector<16x128xf32>
    %3 = tpu.matmul %1, %2, %cst {dimension_numbers = #tpu.dot_dimension_numbers<[1], [0], [0], [1], [0, 0, 1, 1], [], []>} : vector<16x768xbf16>, vector<768x128xbf16>, vector<16x128xf32> -> vector<16x128xf32>
    %c0_3 = arith.constant 0 : index
    %c0_4 = arith.constant 0 : index
    %4 = vector.load %arg3[%c0_3, %c0_4] : memref<1x128xf32, #tpu.memory_space<vmem>>, vector<1x128xf32>
    %5 = vector.broadcast %4 : vector<1x128xf32> to vector<16x128xf32>
    %6 = arith.addf %3, %5 : vector<16x128xf32>
    %7 = arith.truncf %6 : vector<16x128xf32> to vector<16x128xbf16>
    %c0_5 = arith.constant 0 : index
    %c0_6 = arith.constant 0 : index
    %8 = vector.load %arg4[%c0_5, %c0_6] : memref<16x128xbf16, #tpu.memory_space<vmem>>, vector<16x128xbf16>
    tpu.vector_store %arg4[%c0_5, %c0_6], %7 {strides = array<i32>} : memref<16x128xbf16, #tpu.memory_space<vmem>>, vector<16x128xbf16>,
    return
  }
  func.func @transform_0(%arg0: i32) -> (i32, i32) {
    %c0_i32 = arith.constant 0 : i32
    %c0_i32_0 = arith.constant 0 : i32
    return %arg0, %c0_i32 : i32, i32
  }
  func.func @transform_1(%arg0: i32) -> (i32, i32) {
    %c0_i32 = arith.constant 0 : i32
    %c0_i32_0 = arith.constant 0 : i32
    %c0_i32_1 = arith.constant 0 : i32
    return %c0_i32, %c0_i32_0 : i32, i32
  }
  func.func @transform_2(%arg0: i32) -> (i32, i32) {
    %c0_i32 = arith.constant 0 : i32
    %c0_i32_0 = arith.constant 0 : i32
    %c0_i32_1 = arith.constant 0 : i32
    return %c0_i32, %c0_i32_0 : i32, i32
  }
  func.func @transform_3(%arg0: i32) -> (i32, i32) {
    %c0_i32 = arith.constant 0 : i32
    %c0_i32_0 = arith.constant 0 : i32
    return %arg0, %c0_i32 : i32, i32
  }
}

</mosaic_0001>

<bundles_post_ra>
// kernel: mymodel_forward.1
= control target key start
LH: loop header
LB: loop body
LE: loop exit
PB: predicated region body
PF: predicated region fallthrough
CT: control target
= control target key end

     0   :  { %vm577_vm0 = vcmask 1040384   ;;  %s1121_s0 = inlined_call_operand.vmem [shape: f32[2,768], index: 0, kind: input, shape index: {}]   ;;  %s1122_s1 = inlined_call_operand.vmem [shape: bf16[768,128], index: 1, kind: input, shape index: {}]   ;;  %s1123_s2 = inlined_call_operand.vmem [shape: f32[1,128], index: 2, kind: input, shape index: {}]   ;;  %s1124_s3 = inlined_call_operand.vmem [shape: bf16[2,128], index: 3, kind: output, shape index: {}]  }
   0x1   :  { %v861_v0 = vld [vmem:[%s1122_s1 + $0x38] sm:$0xff]  ;;  %v860_v4 = vld [vmem:[%s1122_s1 + $0x30] sm:$0xff]  ;;  %v859_v8 = vld [vmem:[%s1122_s1 + $0x28] sm:$0xff] }
   0x2   :  { %v869_v1 = vld [vmem:[%s1122_s1 + $0x78] sm:$0xff]  ;;  %487 = vmatpush.bf16.msra.mxu0 %v861_v0  ;;  %v868_v5 = vld [vmem:[%s1122_s1 + $0x70] sm:$0xff]  ;;  %v867_v9 = vld [vmem:[%s1122_s1 + $0x68] sm:$0xff] }
   0x3   :  { %v877_v2 = vld [vmem:[%s1122_s1 + $0xb8] sm:$0xff]  ;;  %501 = vmatpush.bf16.msra.mxu1 %v869_v1  ;;  %v876_v6 = vld [vmem:[%s1122_s1 + $0xb0] sm:$0xff]  ;;  %v875_v10 = vld [vmem:[%s1122_s1 + $0xa8] sm:$0xff] }
   0x4   :  { %v885_v3 = vld [vmem:[%s1122_s1 + $0xf8] sm:$0xff]  ;;  %515 = vmatpush.bf16.msra.mxu2 %v877_v2  ;;  %v884_v7 = vld [vmem:[%s1122_s1 + $0xf0] sm:$0xff]  ;;  %v883_v11 = vld [vmem:[%s1122_s1 + $0xe8] sm:$0xff] }
   0x5   :  { %529 = vmatpush.bf16.msra.mxu3 %v885_v3  ;;  %v858_v12 = vld [vmem:[%s1122_s1 + $0x20] sm:$0xff]  ;;  %v16_v17 = vld [vmem:[%s1121_s0 + $0xc] sm:$0xff]  ;;  %v18_v18 = vld [vmem:[%s1121_s0 + $0x18] sm:$0xff] }
   0x6   :  { %488 = vmatpush.bf16.msra.mxu0 %v860_v4  ;;  %v866_v13 = vld [vmem:[%s1122_s1 + $0x60] sm:$0xff]  ;;  %v857_v20 = vld [vmem:[%s1122_s1 + $0x18] sm:$0xff]  ;;  %48 = vst [vmem:[#allocation1 + $0x1] ss:$4 sm:$0xff] %v16_v17  ;;  %v15_v24 = vld [vmem:[%s1121_s0 + $0x8] sm:$0xf] }
   0x7   :  { %502 = vmatpush.bf16.msra.mxu1 %v868_v5  ;;  %v874_v14 = vld [vmem:[%s1122_s1 + $0xa0] sm:$0xff]  ;;  %v865_v21 = vld [vmem:[%s1122_s1 + $0x58] sm:$0xff]  ;;  %50 = vst [vmem:[#allocation1 + $0x2] ss:$4 sm:$0xff] %v18_v18  ;;  %v17_v25 = vld [vmem:[%s1121_s0 + $0x14] sm:$0xf] }
   0x8   :  { %516 = vmatpush.bf16.msra.mxu2 %v876_v6  ;;  %v882_v15 = vld [vmem:[%s1122_s1 + $0xe0] sm:$0xff]  ;;  %v873_v22 = vld [vmem:[%s1122_s1 + $0x98] sm:$0xff]  ;;  %v856_v27 = vld [vmem:[%s1122_s1 + $0x10] sm:$0xff]  ;;  %54 = vst [vmem:[#allocation1 + $0x20] ss:$4 sm:$0xff] %v15_v24 }
   0x9   :  { %530 = vmatpush.bf16.msra.mxu3 %v884_v7  ;;  %v14_v16 = vld [vmem:[%s1121_s0] sm:$0xff]  ;;  %v881_v23 = vld [vmem:[%s1122_s1 + $0xd8] sm:$0xff]  ;;  %v864_v28 = vld [vmem:[%s1122_s1 + $0x50] sm:$0xff]  ;;  %56 = vst [vmem:[#allocation1 + $0x21] ss:$4 sm:$0xff] %v17_v25 }
   0xa   :  { %489 = vmatpush.bf16.msra.mxu0 %v859_v8  ;;  %v20_v19 = vld [vmem:[%s1121_s0 + $0x24] sm:$0xff]  ;;  %46 = vst [vmem:[#allocation1] ss:$4 sm:$0xff] %v14_v16  ;;  %v19_v26 = vld [vmem:[%s1121_s0 + $0x20] sm:$0xf]  ;;  %v872_v29 = vld [vmem:[%s1122_s1 + $0x90] sm:$0xff] }
   0xb   :  { %503 = vmatpush.bf16.msra.mxu1 %v867_v9  ;;  %52 = vst [vmem:[#allocation1 + $0x3] ss:$4 sm:$0xff] %v20_v19  ;;  %v880_v30 = vld [vmem:[%s1122_s1 + $0xd0] sm:$0xff]  ;;  %v21_v31 = vld [vmem:[%s1121_s0 + $0x2c] sm:$0xf]  ;;  %v24_v37 = vld [vmem:[%s1121_s0 + $0x3c] sm:$0xff] }
   0xc   :  { %517 = vmatpush.bf16.msra.mxu2 %v875_v10  ;;  %v855_v32 = vld [vmem:[%s1122_s1 + $0x8] sm:$0xff]  ;;  %58 = vst [vmem:[#allocation1 + $0x22] ss:$4 sm:$0xff] %v19_v26  ;;  %v22_v36 = vld [vmem:[%s1121_s0 + $0x30] sm:$0xff]  ;;  %v854_v43 = vld [vmem:[%s1122_s1] sm:$0xff] }
   0xd   :  { %531 = vmatpush.bf16.msra.mxu3 %v883_v11  ;;  %v863_v33 = vld [vmem:[%s1122_s1 + $0x48] sm:$0xff]  ;;  %60 = vst [vmem:[#allocation1 + $0x23] ss:$4 sm:$0xff] %v21_v31  ;;  %v28_v44 = vld [vmem:[%s1121_s0 + $0x54] sm:$0xff]  ;;  %v862_v45 = vld [vmem:[%s1122_s1 + $0x40] sm:$0xff] }
   0xe   :  { %490 = vmatpush.bf16.msra.mxu0 %v858_v12  ;;  %v871_v34 = vld [vmem:[%s1122_s1 + $0x88] sm:$0xff]  ;;  %v893_v46 = vld [vmem:[%s1122_s1 + $0x138] sm:$0xff]  ;;  %v870_v48 = vld [vmem:[%s1122_s1 + $0x80] sm:$0xff] }
   0xf   :  { %504 = vmatpush.bf16.msra.mxu1 %v866_v13  ;;  %v879_v35 = vld [vmem:[%s1122_s1 + $0xc8] sm:$0xff]  ;;  %v901_v47 = vld [vmem:[%s1122_s1 + $0x178] sm:$0xff]  ;;  %v878_v49 = vld [vmem:[%s1122_s1 + $0xc0] sm:$0xff] }
  0x10   :  { %518 = vmatpush.bf16.msra.mxu2 %v874_v14  ;;  %v26_v38 = vld [vmem:[%s1121_s0 + $0x48] sm:$0xff]  ;;  %v23_v50 = vld [vmem:[%s1121_s0 + $0x38] sm:$0xf]  ;;  %v25_v51 = vld [vmem:[%s1121_s0 + $0x44] sm:$0xf] }
  0x11   :  { %532 = vmatpush.bf16.msra.mxu3 %v882_v15  ;;  %v27_v52 = vld [vmem:[%s1121_s0 + $0x50] sm:$0xf]  ;;  %v29_v55 = vld [vmem:[%s1121_s0 + $0x5c] sm:$0xf]  ;;  %v891_v58 = vld [vmem:[%s1122_s1 + $0x128] sm:$0xff] }
  0x12   :  { %491 = vmatpush.bf16.msra.mxu0 %v857_v20  ;;  %v61_v39 = vld.sshfl [vmem:[#allocation1] sm:$0xff pattern:$0x73625140]  ;;  %v62_v40 = vld.sshfl [vmem:[#allocation1 + $0x8] sm:$0xff pattern:$0x73625140] }
  0x13   :  { %505 = vmatpush.bf16.msra.mxu1 %v865_v21  ;;  %v63_v41 = vld.sshfl [vmem:[#allocation1 + $0x10] sm:$0xff pattern:$0x73625140]  ;;  %v64_v42 = vld.sshfl [vmem:[#allocation1 + $0x18] sm:$0xff pattern:$0x73625140] }
  0x14   :  { %519 = vmatpush.bf16.msra.mxu2 %v873_v22  ;;  %67 = vst [vmem:[#allocation1] ss:$4 sm:$0xff] %v22_v36  ;;  %v65_v53 = vld.sshfl [vmem:[#allocation1 + $0x20] sm:$0xff pattern:$0x73625140]  ;;  %v892_v56 = vld [vmem:[%s1122_s1 + $0x130] sm:$0xff] }
  0x15   :  { %533 = vmatpush.bf16.msra.mxu3 %v881_v23  ;;  %68 = vst [vmem:[#allocation1 + $0x1] ss:$4 sm:$0xff] %v24_v37  ;;  %v66_v54 = vld.sshfl [vmem:[#allocation1 + $0x28] sm:$0xff pattern:$0x73625140]  ;;  %v900_v57 = vld [vmem:[%s1122_s1 + $0x170] sm:$0xff] }
  0x16   :  { %492 = vmatpush.bf16.msra.mxu0 %v856_v27  ;;  %69 = vst [vmem:[#allocation1 + $0x2] ss:$4 sm:$0xff] %v26_v38  ;;  %v899_v59 = vld [vmem:[%s1122_s1 + $0x168] sm:$0xff]  ;;  %v890_v4 = vld [vmem:[%s1122_s1 + $0x120] sm:$0xff]  ;;  %v889_v6 = vld [vmem:[%s1122_s1 + $0x118] sm:$0xff] }
  0x17   :  { %506 = vmatpush.bf16.msra.mxu1 %v864_v28  ;;  %70 = vst [vmem:[#allocation1 + $0x3] ss:$4 sm:$0xff] %v28_v44  ;;  %v898_v5 = vld [vmem:[%s1122_s1 + $0x160] sm:$0xff]  ;;  %v897_v7 = vld [vmem:[%s1122_s1 + $0x158] sm:$0xff]  ;;  %v888_v8 = vld [vmem:[%s1122_s1 + $0x110] sm:$0xff] }
  0x18   :  { %520 = vmatpush.bf16.msra.mxu2 %v872_v29  ;;  %71 = vst [vmem:[#allocation1 + $0x20] ss:$4 sm:$0xff] %v23_v50  ;;  %v896_v9 = vld [vmem:[%s1122_s1 + $0x150] sm:$0xff]  ;;  %v887_v10 = vld [vmem:[%s1122_s1 + $0x108] sm:$0xff]  ;;  %v886_v12 = vld [vmem:[%s1122_s1 + $0x100] sm:$0xff] }
  0x19   :  { %534 = vmatpush.bf16.msra.mxu3 %v880_v30  ;;  %72 = vst [vmem:[#allocation1 + $0x21] ss:$4 sm:$0xff] %v25_v51  ;;  %v895_v11 = vld [vmem:[%s1122_s1 + $0x148] sm:$0xff]  ;;  %v894_v14 = vld [vmem:[%s1122_s1 + $0x140] sm:$0xff] }
  0x1a   :  { %493 = vmatpush.bf16.msra.mxu0 %v855_v32  ;;  %73 = vst [vmem:[#allocation1 + $0x22] ss:$4 sm:$0xff] %v27_v52  ;;  %v902_v19 = vld [vmem:[%s1123_s2] ss:$0 sm:$0xff] }
  0x1b   :  { %507 = vmatpush.bf16.msra.mxu1 %v863_v33  ;;  %74 = vst [vmem:[#allocation1 + $0x23] ss:$4 sm:$0xff] %v29_v55 }
  0x1c   :  { %521 = vmatpush.bf16.msra.mxu2 %v871_v34 }
  0x1d   :  { %535 = vmatpush.bf16.msra.mxu3 %v879_v35 }
  0x1e   :  { %494 = vmatpush.bf16.msra.mxu0 %v854_v43  ;;  %v77_v60 = vld.sshfl [vmem:[#allocation1 + $0x10] sm:$0xff pattern:$0x73625140]  ;;  %v75_v61 = vld.sshfl [vmem:[#allocation1] sm:$0xff pattern:$0x73625140] }
  0x1f   :  { %508 = vmatpush.bf16.msra.mxu1 %v862_v45  ;;  %v95_v62 = vpack.c.bf16 %v77_v60, %v63_v41  ;;  %v93_v63 = vpack.c.bf16 %v75_v61, %v61_v39  ;;  %v78_v0 = vld.sshfl [vmem:[#allocation1 + $0x18] sm:$0xff pattern:$0x73625140]  ;;  %v76_v1 = vld.sshfl [vmem:[#allocation1 + $0x8] sm:$0xff pattern:$0x73625140] }
  0x20   :  { %522 = vmatpush.bf16.msra.mxu2 %v870_v48  ;;  %v96_v2 = vpack.c.bf16 %v78_v0, %v64_v42  ;;  %v94_v3 = vpack.c.bf16 %v76_v1, %v62_v40 }
  0x21   :  { %536 = vmatpush.bf16.msra.mxu3 %v878_v49  ;;  %495 = vmatmul.bf16.vlgmr.msra.gmra.mxu0 %v93_v63 }
  0x22   :  { %543 = vmatpush.bf16.msrb.mxu0 %v893_v46  ;;  %509 = vmatmul.bf16.vlgmr.msra.gmra.mxu1 %v94_v3  ;;  %v79_v13 = vld.sshfl [vmem:[#allocation1 + $0x20] sm:$0xff pattern:$0x73625140]  ;;  %v80_v15 = vld.sshfl [vmem:[#allocation1 + $0x28] sm:$0xff pattern:$0x73625140] }
  0x23   :  { %557 = vmatpush.bf16.msrb.mxu1 %v901_v47  ;;  %523 = vmatmul.bf16.vlgmr.msra.gmra.mxu2 %v95_v62  ;;  %v97_v16 = vpack.c.bf16 %v79_v13, %v65_v53  ;;  %v98_v17 = vpack.c.bf16 %v80_v15, %v66_v54 }
  0x24   :  { %537 = vmatmul.bf16.vlgmr.msra.gmra.mxu3 %v96_v2 }
  0x26   :  { %544 = vmatpush.bf16.msrb.mxu0 %v892_v56 }
  0x27   :  { %558 = vmatpush.bf16.msrb.mxu1 %v900_v57 }
  0x2a   :  { %545 = vmatpush.bf16.msrb.mxu0 %v891_v58 }
  0x2b   :  { %559 = vmatpush.bf16.msrb.mxu1 %v899_v59 }
  0x2e   :  { %546 = vmatpush.bf16.msrb.mxu0 %v890_v4 }
  0x2f   :  { %560 = vmatpush.bf16.msrb.mxu1 %v898_v5 }
  0x32   :  { %547 = vmatpush.bf16.msrb.mxu0 %v889_v6 }
  0x33   :  { %561 = vmatpush.bf16.msrb.mxu1 %v897_v7 }
  0x36   :  { %548 = vmatpush.bf16.msrb.mxu0 %v888_v8 }
  0x37   :  { %562 = vmatpush.bf16.msrb.mxu1 %v896_v9 }
  0x3a   :  { %549 = vmatpush.bf16.msrb.mxu0 %v887_v10 }
  0x3b   :  { %563 = vmatpush.bf16.msrb.mxu1 %v895_v11 }
  0x3e   :  { %550 = vmatpush.bf16.msrb.mxu0 %v886_v12 }
  0x3f   :  { %564 = vmatpush.bf16.msrb.mxu1 %v894_v14 }
  0x41   :  { %551 = vmatmul.bf16.vlgmr.msrb.gmra.mxu0 %v97_v16 }
  0x42   :  { %565 = vmatmul.bf16.vlgmr.msrb.gmra.mxu1 %v98_v17 }
  0x9e   :  { %v496_v18 = vpop.f32.mrf.mxu0 }
  0x9f   :  { %v510_v20 = vpop.f32.mrf.mxu1  ;;  %v497_v21 = vadd.f32 %v902_v19, %v496_v18 }
  0xa1   :  { %v511_v22 = vadd.f32 %v510_v20, %v497_v21 }
  0xa6   :  { %v524_v23 = vpop.f32.mrf.mxu2  ;;  %v498_v24 = vpop.f32.mrf.mxu0 }
  0xa7   :  { %v512_v25 = vpop.f32.mrf.mxu1  ;;  %v525_v26 = vadd.f32 %v524_v23, %v511_v22  ;;  %v538_v27 = vpop.f32.mrf.mxu3 }
  0xa9   :  { %v539_v28 = vadd.f32 %v538_v27, %v525_v26 }
  0xae   :  { %v526_v30 = vpop.f32.mrf.mxu2 }
  0xaf   :  { %v540_v34 = vpop.f32.mrf.mxu3 }
  0xbe   :  { %v552_v29 = vpop.f32.mrf.mxu0 }
  0xbf   :  { %v553_v31 = vadd.f32 %v552_v29, %v539_v28  ;;  %v566_v32 = vpop.f32.mrf.mxu1 }
  0xc1   :  { %v567_v33 = vadd.f32 %v566_v32, %v553_v31 }
  0xc3   :  { %v571_v35 = vpack.c.bf16 %v567_v33, %v567_v33 }
  0xc5   :  { %v575_v36 = vrot.slane %v571_v35, 3 }
  0xc6   :  { %v554_v37 = vpop.f32.mrf.mxu0 }
  0xc7   :  { %v580_v38 = vsel %vm577_vm0, %v571_v35, %v575_v36  ;;  %v568_v39 = vpop.f32.mrf.mxu1 }
  0xc8   :  { %613 = vst [vmem:[#allocation2] sm:$0x1] %v580_v38 }
  0xcf   :  { %v639_v40 = vld [vmem:[#allocation2] sm:$0x1] }
  0xd0   :  { %640 = vst [vmem:[%s1124_s3] sm:$0x1] %v639_v40 }

</bundles_post_ra>
